<compile_context>
chip_gen: v7x
topology: tpu7x:2x2x1
jax: 0.10.0
libtpu: 0.0.40
codegen_flags: <defaults>
</compile_context>

<pallas_src>
import math

import jax
import jax.numpy as jnp
from jax.experimental import pallas as pl
from jax.experimental.pallas import tpu as pltpu


# --------------------------------------------------------------------------------------
# helpers
# --------------------------------------------------------------------------------------
def _round_up(x: int, m: int) -> int:
    return (x + m - 1) // m * m


def _vmem_cap_bytes() -> int:
    """Generation-aware usable-VMEM cap (physical minus headroom for Mosaic scratch)."""
    phys = None
    try:
        info = pltpu.get_tpu_info()
        phys = int(getattr(info, "vmem_capacity_bytes"))
    except Exception:
        phys = None
    if not phys:
        phys = 64 << 20  # conservative (v7x-sized) default
    return int(max(phys - (16 << 20), 32 << 20))


def _choose_batch_tile(B: int, max_tb: int) -> int:
    """Batch tile: multiple of 16 (bf16 sublane pack), >=2 grid steps when B allows (v7x)."""
    b16 = _round_up(max(B, 1), 16)
    tb = min(max_tb, b16)
    if b16 >= 32:
        tb = min(tb, _round_up((b16 + 1) // 2, 16))
    return max(16, (tb // 16) * 16)


def _shrink_tile(tb: int) -> int:
    return max(16, ((tb // 2) // 16) * 16)


def _pick_feature_tile(dim_p: int) -> int:
    for t in (512, 256, 128):
        if t <= dim_p and dim_p % t == 0:
            return t
    return dim_p  # dim_p is always a multiple of 128


# --------------------------------------------------------------------------------------
# parameter preparation (done ONCE, outside the forward pass)
# --------------------------------------------------------------------------------------
def init_dense_params(key, layer_dims):
    """PyTorch nn.Linear-style uniform init; weights stored (in, out) == W_pt.T."""
    params = []
    for i in range(len(layer_dims) - 1):
        fan_in, fan_out = layer_dims[i], layer_dims[i + 1]
        key, kw, kb = jax.random.split(key, 3)
        bound = 1.0 / math.sqrt(fan_in)
        w = jax.random.uniform(kw, (fan_in, fan_out), jnp.float32, -bound, bound)
        b = jax.random.uniform(kb, (fan_out,), jnp.float32, -bound, bound)
        params.append((w, b))
    return params


def prepare_params(params):
    """Pad feature dims to 128 multiples and cast once: W -> bf16 (in_p, out_p),
    b -> f32 (1, out_p). Returns [(w_pad, b_pad, in_dim, out_dim), ...]."""
    prepared = []
    for w, b in params:
        i_d, o_d = w.shape
        i_p, o_p = _round_up(i_d, 128), _round_up(o_d, 128)
        wp = jnp.pad(w.astype(jnp.bfloat16), ((0, i_p - i_d), (0, o_p - o_d)))
        bp = jnp.pad(b.astype(jnp.float32).reshape(1, -1), ((0, 0), (0, o_p - o_d)))
        prepared.append((wp, bp, i_d, o_d))
    return prepared


# --------------------------------------------------------------------------------------
# fused kernel (whole MLP per batch tile; weights VMEM-resident)
# --------------------------------------------------------------------------------------
def make_mlp_kernel(num_linear: int):
    """Ref layout: (x_ref, w0, b0, w1, b1, ..., o_ref). ReLU after all but the last linear."""

    def kernel(*refs):
        x_ref = refs[0]
        o_ref = refs[-1]
        h = x_ref[...]                                     # bf16 (TB, in_p)
        for i in range(num_linear):
            w = refs[1 + 2 * i][...]                       # bf16 (in_p_i, out_p_i)
            b = refs[2 + 2 * i][...]                       # f32  (1, out_p_i)
            acc = jnp.dot(h, w, preferred_element_type=jnp.float32) + b
            if i < num_linear - 1:
                acc = jnp.maximum(acc, 0.0)                # elementwise in f32 (v5e-safe)
                h = acc.astype(jnp.bfloat16)               # bf16 only at MXU boundary
            else:
                h = acc
        o_ref[...] = h.astype(o_ref.dtype)

    return kernel


def _fused_forward(x_pad, prepared, TB, out_p, out_dtype, vmem_cap, single_buffer_weights):
    B_pad, in_p = x_pad.shape
    num_linear = len(prepared)

    weight_kwargs = {}
    if single_buffer_weights:
        # grid-invariant operands do not need double buffers
        weight_kwargs = dict(pipeline_mode=pl.Buffered(1))

    args = [x_pad]
    in_specs = [pl.BlockSpec((TB, in_p), lambda i: (i, 0))]
    param_bytes = 0
    flops = 0
    max_p = in_p
    for wp, bp, _, _ in prepared:
        i_p, o_p = wp.shape
        max_p = max(max_p, o_p)
        args.append(wp)
        in_specs.append(pl.BlockSpec((i_p, o_p), lambda i: (0, 0), **weight_kwargs))
        args.append(bp)
        in_specs.append(pl.BlockSpec((1, o_p), lambda i: (0, 0), **weight_kwargs))
        param_bytes += wp.size * 2 + bp.size * 4
        flops += 2 * B_pad * i_p * o_p

    out_bytes = jnp.dtype(out_dtype).itemsize
    wbufs = 1 if single_buffer_weights else 2
    vmem_est = (wbufs * param_bytes
                + 2 * TB * in_p * 2 + 2 * TB * out_p * out_bytes   # double-buffered x / out
                + 3 * TB * max_p * 4                                # f32 intermediate slabs
                + (4 << 20))                                        # headroom
    vmem_limit = int(min(max(vmem_est, 32 << 20), vmem_cap))

    return pl.pallas_call(
        make_mlp_kernel(num_linear),
        out_shape=jax.ShapeDtypeStruct((B_pad, out_p), out_dtype),
        grid=(B_pad // TB,),
        in_specs=in_specs,
        out_specs=pl.BlockSpec((TB, out_p), lambda i: (i, 0)),
        compiler_params=pltpu.CompilerParams(
            dimension_semantics=("parallel",),      # batch tiles shard across TCs (v7x)
            vmem_limit_bytes=vmem_limit),
        cost_estimate=pl.CostEstimate(
            flops=flops, transcendentals=0,
            bytes_accessed=x_pad.size * 2 + B_pad * out_p * out_bytes + param_bytes),
    )(*args)


# --------------------------------------------------------------------------------------
# fallback path: per-layer (M, N, K)-tiled matmul, bias+ReLU fused into the K-epilogue
# --------------------------------------------------------------------------------------
def _linear_kernel(apply_relu: bool):
    def kernel(x_ref, w_ref, b_ref, o_ref, acc_ref):
        @pl.when(pl.program_id(2) == 0)
        def _():
            acc_ref[...] = jnp.zeros_like(acc_ref)

        acc_ref[...] += jnp.dot(x_ref[...], w_ref[...], preferred_element_type=jnp.float32)

        @pl.when(pl.program_id(2) == pl.num_programs(2) - 1)
        def _():
            r = acc_ref[...] + b_ref[...]
            if apply_relu:
                r = jnp.maximum(r, 0.0)
            o_ref[...] = r.astype(o_ref.dtype)

    return kernel


def _linear_pallas(h, wp, bp, apply_relu, out_dtype, tm, vmem_cap):
    Mp, Kp = h.shape
    _, Np = wp.shape
    tk = _pick_feature_tile(Kp)
    tn = _pick_feature_tile(Np)
    ob = jnp.dtype(out_dtype).itemsize
    vmem_est = (2 * (tm * tk * 2 + tk * tn * 2 + tn * 4 + tm * tn * ob)
                + tm * tn * 4 + (2 << 20))
    vmem_limit = int(min(max(vmem_est, 32 << 20), vmem_cap))
    return pl.pallas_call(
        _linear_kernel(apply_relu),
        out_shape=jax.ShapeDtypeStruct((Mp, Np), out_dtype),
        grid=(Mp // tm, Np // tn, Kp // tk),
        in_specs=[pl.BlockSpec((tm, tk), lambda i, j, k: (i, k)),
                  pl.BlockSpec((tk, tn), lambda i, j, k: (k, j)),
                  pl.BlockSpec((1, tn), lambda i, j, k: (0, j))],
        out_specs=pl.BlockSpec((tm, tn), lambda i, j, k: (i, j)),
        scratch_shapes=[pltpu.VMEM((tm, tn), jnp.float32)],
        compiler_params=pltpu.CompilerParams(
            dimension_semantics=("parallel", "parallel", "arbitrary"),
            vmem_limit_bytes=vmem_limit),
        cost_estimate=pl.CostEstimate(
            flops=2 * Mp * Kp * Np, transcendentals=0,
            bytes_accessed=Mp * Kp * 2 + Kp * Np * 2 + Mp * Np * ob),
    )(h, wp, bp)


def _layered_forward(x_pad, prepared, TB, out_dtype, vmem_cap):
    h = x_pad
    n = len(prepared)
    for i, (wp, bp, _, _) in enumerate(prepared):
        last = i == n - 1
        h = _linear_pallas(h, wp, bp, apply_relu=not last,
                           out_dtype=out_dtype if last else jnp.bfloat16,
                           tm=TB, vmem_cap=vmem_cap)
    return h


# --------------------------------------------------------------------------------------
# forward (equivalent to DenseModel.forward)
# --------------------------------------------------------------------------------------
def dense_model_forward(x, prepared, output_shape=None, max_block_batch=512,
                        force_layered=False):
    """x: (B, *). Flatten -> fused MLP -> optional Unflatten. `prepared` from prepare_params."""
    B = x.shape[0]
    x2 = x.reshape(B, -1)                                   # nn.Flatten()
    in_dim = x2.shape[1]
    assert in_dim == prepared[0][2], "input features do not match first layer"
    out_dim = prepared[-1][3]
    if output_shape is not None:
        assert math.prod(output_shape) == out_dim, "output_shape does not match last layer"

    out_dtype = x.dtype
    in_p = prepared[0][0].shape[0]
    out_p = prepared[-1][0].shape[1]
    out_bytes = jnp.dtype(out_dtype).itemsize
    vmem_cap = _vmem_cap_bytes()

    param_bytes = sum(wp.size * 2 + bp.size * 4 for wp, bp, _, _ in prepared)
    max_p = max([in_p] + [wp.shape[1] for wp, _, _, _ in prepared])

    def fused_vmem_est(tb):                                  # optimistic: single-buffered weights
        return (param_bytes + 2 * tb * in_p * 2 + 2 * tb * out_p * out_bytes
                + 3 * tb * max_p * 4 + (4 << 20))

    # ---- adaptive batch tile ----
    TB = _choose_batch_tile(B, max_block_batch)
    while TB > 16 and fused_vmem_est(TB) > vmem_cap:
        nt = _shrink_tile(TB)
        if nt == TB:
            break
        TB = nt
    use_layered = force_layered or fused_vmem_est(TB) > vmem_cap

    # ---- pad input (feature dim to 128 lanes, batch to a full tile) ----
    B_pad = _round_up(max(B, 1), TB)
    x_pad = x2 if x2.dtype == jnp.bfloat16 else x2.astype(jnp.bfloat16)
    if B_pad != B or in_p != in_dim:
        x_pad = jnp.pad(x_pad, ((0, B_pad - B), (0, in_p - in_dim)))

    if use_layered:
        out_pad = _layered_forward(x_pad, prepared, TB, out_dtype, vmem_cap)
    else:
        try:
            out_pad = jax.block_until_ready(
                _fused_forward(x_pad, prepared, TB, out_p, out_dtype, vmem_cap,
                               single_buffer_weights=True))
        except Exception:
            # Mosaic/jax version without Buffered(1) support: default double buffering.
            out_pad = _fused_forward(x_pad, prepared, TB, out_p, out_dtype, vmem_cap,
                                     single_buffer_weights=False)

    out = out_pad
    if B_pad != B or out_p != out_dim:
        out = out[:B, :out_dim]
    if out.dtype != out_dtype:
        out = out.astype(out_dtype)
    if output_shape is not None:
        out = out.reshape((B, *output_shape))               # nn.Unflatten(1, output_shape)
    return out


# --------------------------------------------------------------------------------------
# references
# --------------------------------------------------------------------------------------
def dense_model_ref_f32(x, params, output_shape=None):
    """Pure-f32 JAX reference (PyTorch semantics)."""
    B = x.shape[0]
    h = x.reshape(B, -1)
    n = len(params)
    for i, (w, b) in enumerate(params):
        h = h @ w + b.reshape(1, -1)
        if i < n - 1:
            h = jnp.maximum(h, 0.0)
    if output_shape is not None:
        h = h.reshape((B, *output_shape))
    return h


def dense_model_ref_mixed(x, params, output_shape=None):
    """Reference mirroring the kernel precision policy (bf16 MXU inputs, f32 acc/elementwise)."""
    B = x.shape[0]
    h = x.reshape(B, -1).astype(jnp.bfloat16)
    n = len(params)
    for i, (w, b) in enumerate(params):
        acc = jnp.dot(h, w.astype(jnp.bfloat16),
                      preferred_element_type=jnp.float32) + b.reshape(1, -1)
        if i < n - 1:
            h = jnp.maximum(acc, 0.0).astype(jnp.bfloat16)
        else:
            h = acc
    out = h.astype(x.dtype)
    if output_shape is not None:
        out = out.reshape((B, *output_shape))
    return out


if __name__ == "__main__":
    # DenseModel(layer_dims=[64, 128, 256, 32], output_shape=[2, 16])
    layer_dims = [64, 128, 256, 32]
    output_shape = (2, 16)
    batch = 4

    key = jax.random.PRNGKey(0)
    key, kx = jax.random.split(key)
    x = jax.random.normal(kx, (batch, layer_dims[0]), jnp.float32)
    params = init_dense_params(key, layer_dims)
    prepared = prepare_params(params)                       # one-time pad + cast

    # fused resident-weight path (small batch -> TB=16, single grid step)
    out = jax.block_until_ready(dense_model_forward(x, prepared, output_shape=output_shape))
    assert out.shape == (batch, *output_shape), out.shape
    ref_mixed = dense_model_ref_mixed(x, params, output_shape=output_shape)
    ref_f32 = dense_model_ref_f32(x, params, output_shape=output_shape)
    assert jnp.allclose(out, ref_mixed, atol=1e-3, rtol=1e-3), "mismatch vs mixed-precision ref"
    assert jnp.allclose(out, ref_f32, atol=5e-2, rtol=5e-2), "mismatch vs f32 ref"

    # exercise the large-model fallback path (per-layer tiled matmuls) on the same input
    out_layered = jax.block_until_ready(
        dense_model_forward(x, prepared, output_shape=output_shape, force_layered=True))
    assert out_layered.shape == (batch, *output_shape)
    assert jnp.allclose(out_layered, ref_mixed, atol=1e-3, rtol=1e-3), "layered path mismatch"

    # larger batch -> adaptive TB with a >=2-step parallel grid (v7x megacore path)
    key, kx2 = jax.random.split(key)
    xb = jax.random.normal(kx2, (100, layer_dims[0]), jnp.float32)
    outb = jax.block_until_ready(dense_model_forward(xb, prepared, output_shape=output_shape))
    assert outb.shape == (100, *output_shape)
    assert jnp.allclose(outb, dense_model_ref_mixed(xb, params, output_shape=output_shape),
                        atol=1e-3, rtol=1e-3), "multi-tile batch mismatch"

    print("KERNEL_OK")
</pallas_src>

<mosaic_0001>
module attributes {stable_mosaic.version = 11 : i64} {
  func.func @kernel(%arg0: i32, %arg1: memref<16x128xbf16, #tpu.memory_space<vmem>>, %arg2: memref<128x128xbf16, #tpu.memory_space<vmem>>, %arg3: memref<1x128xf32, #tpu.memory_space<vmem>>, %arg4: memref<128x256xbf16, #tpu.memory_space<vmem>>, %arg5: memref<1x256xf32, #tpu.memory_space<vmem>>, %arg6: memref<256x128xbf16, #tpu.memory_space<vmem>>, %arg7: memref<1x128xf32, #tpu.memory_space<vmem>>, %arg8: memref<16x128xf32, #tpu.memory_space<vmem>>) attributes {dimension_semantics = [#tpu.dimension_semantics<parallel>], iteration_bounds = array<i64: 1>, scalar_prefetch = 0 : i64, scratch_operands = 0 : i64, tpu.core_type = #tpu.core_type<tc>, window_params = [{transform_indices = @transform_0, window_bounds = array<i64: 16, 128>}, {pipeline_mode = #tpu.pipeline_mode<synchronous>, transform_indices = @transform_1, window_bounds = array<i64: 128, 128>}, {pipeline_mode = #tpu.pipeline_mode<synchronous>, transform_indices = @transform_2, window_bounds = array<i64: 1, 128>}, {pipeline_mode = #tpu.pipeline_mode<synchronous>, transform_indices = @transform_3, window_bounds = array<i64: 128, 256>}, {pipeline_mode = #tpu.pipeline_mode<synchronous>, transform_indices = @transform_4, window_bounds = array<i64: 1, 256>}, {pipeline_mode = #tpu.pipeline_mode<synchronous>, transform_indices = @transform_5, window_bounds = array<i64: 256, 128>}, {pipeline_mode = #tpu.pipeline_mode<synchronous>, transform_indices = @transform_6, window_bounds = array<i64: 1, 128>}, {transform_indices = @transform_7, window_bounds = array<i64: 16, 128>}]} {
    %c0 = arith.constant 0 : index
    %c0_0 = arith.constant 0 : index
    %0 = vector.load %arg1[%c0, %c0_0] : memref<16x128xbf16, #tpu.memory_space<vmem>>, vector<16x128xbf16>
    %c0_1 = arith.constant 0 : index
    %c0_2 = arith.constant 0 : index
    %1 = vector.load %arg2[%c0_1, %c0_2] : memref<128x128xbf16, #tpu.memory_space<vmem>>, vector<128x128xbf16>
    %c0_3 = arith.constant 0 : index
    %c0_4 = arith.constant 0 : index
    %2 = vector.load %arg3[%c0_3, %c0_4] : memref<1x128xf32, #tpu.memory_space<vmem>>, vector<1x128xf32>
    %cst = arith.constant dense<0.000000e+00> : vector<16x128xf32>
    %3 = tpu.matmul %0, %1, %cst {dimension_numbers = #tpu.dot_dimension_numbers<[1], [0], [0], [1], [0, 0, 1, 1], [], []>} : vector<16x128xbf16>, vector<128x128xbf16>, vector<16x128xf32> -> vector<16x128xf32>
    %4 = vector.broadcast %2 : vector<1x128xf32> to vector<16x128xf32>
    %5 = arith.addf %3, %4 : vector<16x128xf32>
    %cst_5 = arith.constant 0.000000e+00 : f32
    %6 = vector.broadcast %cst_5 : f32 to vector<16x128xf32>
    %7 = arith.maximumf %5, %6 : vector<16x128xf32>
    %8 = arith.truncf %7 : vector<16x128xf32> to vector<16x128xbf16>
    %c0_6 = arith.constant 0 : index
    %c0_7 = arith.constant 0 : index
    %9 = vector.load %arg4[%c0_6, %c0_7] : memref<128x256xbf16, #tpu.memory_space<vmem>>, vector<128x256xbf16>
    %c0_8 = arith.constant 0 : index
    %c0_9 = arith.constant 0 : index
    %10 = vector.load %arg5[%c0_8, %c0_9] : memref<1x256xf32, #tpu.memory_space<vmem>>, vector<1x256xf32>
    %cst_10 = arith.constant dense<0.000000e+00> : vector<16x256xf32>
    %11 = tpu.matmul %8, %9, %cst_10 {dimension_numbers = #tpu.dot_dimension_numbers<[1], [0], [0], [1], [0, 0, 1, 1], [], []>} : vector<16x128xbf16>, vector<128x256xbf16>, vector<16x256xf32> -> vector<16x256xf32>
    %12 = vector.broadcast %10 : vector<1x256xf32> to vector<16x256xf32>
    %13 = arith.addf %11, %12 : vector<16x256xf32>
    %cst_11 = arith.constant 0.000000e+00 : f32
    %14 = vector.broadcast %cst_11 : f32 to vector<16x256xf32>
    %15 = arith.maximumf %13, %14 : vector<16x256xf32>
    %16 = arith.truncf %15 : vector<16x256xf32> to vector<16x256xbf16>
    %c0_12 = arith.constant 0 : index
    %c0_13 = arith.constant 0 : index
    %17 = vector.load %arg6[%c0_12, %c0_13] : memref<256x128xbf16, #tpu.memory_space<vmem>>, vector<256x128xbf16>
    %c0_14 = arith.constant 0 : index
    %c0_15 = arith.constant 0 : index
    %18 = vector.load %arg7[%c0_14, %c0_15] : memref<1x128xf32, #tpu.memory_space<vmem>>, vector<1x128xf32>
    %cst_16 = arith.constant dense<0.000000e+00> : vector<16x128xf32>
    %19 = tpu.matmul %16, %17, %cst_16 {dimension_numbers = #tpu.dot_dimension_numbers<[1], [0], [0], [1], [0, 0, 1, 1], [], []>} : vector<16x256xbf16>, vector<256x128xbf16>, vector<16x128xf32> -> vector<16x128xf32>
    %20 = vector.broadcast %18 : vector<1x128xf32> to vector<16x128xf32>
    %21 = arith.addf %19, %20 : vector<16x128xf32>
    %c0_17 = arith.constant 0 : index
    %c0_18 = arith.constant 0 : index
    %22 = vector.load %arg8[%c0_17, %c0_18] : memref<16x128xf32, #tpu.memory_space<vmem>>, vector<16x128xf32>
    tpu.vector_store %arg8[%c0_17, %c0_18], %21 {strides = array<i32>} : memref<16x128xf32, #tpu.memory_space<vmem>>, vector<16x128xf32>,
    return
  }
  func.func @transform_0(%arg0: i32) -> (i32, i32) {
    %c0_i32 = arith.constant 0 : i32
    %c0_i32_0 = arith.constant 0 : i32
    return %arg0, %c0_i32 : i32, i32
  }
  func.func @transform_1(%arg0: i32) -> (i32, i32) {
    %c0_i32 = arith.constant 0 : i32
    %c0_i32_0 = arith.constant 0 : i32
    %c0_i32_1 = arith.constant 0 : i32
    return %c0_i32, %c0_i32_0 : i32, i32
  }
  func.func @transform_2(%arg0: i32) -> (i32, i32) {
    %c0_i32 = arith.constant 0 : i32
    %c0_i32_0 = arith.constant 0 : i32
    %c0_i32_1 = arith.constant 0 : i32
    return %c0_i32, %c0_i32_0 : i32, i32
  }
  func.func @transform_3(%arg0: i32) -> (i32, i32) {
    %c0_i32 = arith.constant 0 : i32
    %c0_i32_0 = arith.constant 0 : i32
    %c0_i32_1 = arith.constant 0 : i32
    return %c0_i32, %c0_i32_0 : i32, i32
  }
  func.func @transform_4(%arg0: i32) -> (i32, i32) {
    %c0_i32 = arith.constant 0 : i32
    %c0_i32_0 = arith.constant 0 : i32
    %c0_i32_1 = arith.constant 0 : i32
    return %c0_i32, %c0_i32_0 : i32, i32
  }
  func.func @transform_5(%arg0: i32) -> (i32, i32) {
    %c0_i32 = arith.constant 0 : i32
    %c0_i32_0 = arith.constant 0 : i32
    %c0_i32_1 = arith.constant 0 : i32
    return %c0_i32, %c0_i32_0 : i32, i32
  }
  func.func @transform_6(%arg0: i32) -> (i32, i32) {
    %c0_i32 = arith.constant 0 : i32
    %c0_i32_0 = arith.constant 0 : i32
    %c0_i32_1 = arith.constant 0 : i32
    return %c0_i32, %c0_i32_0 : i32, i32
  }
  func.func @transform_7(%arg0: i32) -> (i32, i32) {
    %c0_i32 = arith.constant 0 : i32
    %c0_i32_0 = arith.constant 0 : i32
    return %arg0, %c0_i32 : i32, i32
  }
}

module attributes {stable_mosaic.version = 11 : i64} {
  func.func @kernel(%arg0: i32, %arg1: memref<16x128xbf16, #tpu.memory_space<vmem>>, %arg2: memref<128x128xbf16, #tpu.memory_space<vmem>>, %arg3: memref<1x128xf32, #tpu.memory_space<vmem>>, %arg4: memref<128x256xbf16, #tpu.memory_space<vmem>>, %arg5: memref<1x256xf32, #tpu.memory_space<vmem>>, %arg6: memref<256x128xbf16, #tpu.memory_space<vmem>>, %arg7: memref<1x128xf32, #tpu.memory_space<vmem>>, %arg8: memref<16x128xf32, #tpu.memory_space<vmem>>) attributes {dimension_semantics = [#tpu.dimension_semantics<parallel>], iteration_bounds = array<i64: 1>, scalar_prefetch = 0 : i64, scratch_operands = 0 : i64, tpu.core_type = #tpu.core_type<tc>, window_params = [{transform_indices = @transform_0, window_bounds = array<i64: 16, 128>}, {pipeline_mode = #tpu.pipeline_mode<synchronous>, transform_indices = @transform_1, window_bounds = array<i64: 128, 128>}, {pipeline_mode = #tpu.pipeline_mode<synchronous>, transform_indices = @transform_2, window_bounds = array<i64: 1, 128>}, {pipeline_mode = #tpu.pipeline_mode<synchronous>, transform_indices = @transform_3, window_bounds = array<i64: 128, 256>}, {pipeline_mode = #tpu.pipeline_mode<synchronous>, transform_indices = @transform_4, window_bounds = array<i64: 1, 256>}, {pipeline_mode = #tpu.pipeline_mode<synchronous>, transform_indices = @transform_5, window_bounds = array<i64: 256, 128>}, {pipeline_mode = #tpu.pipeline_mode<synchronous>, transform_indices = @transform_6, window_bounds = array<i64: 1, 128>}, {transform_indices = @transform_7, window_bounds = array<i64: 16, 128>}]} {
    %c0 = arith.constant 0 : index
    %c0_0 = arith.constant 0 : index
    %0 = vector.load %arg1[%c0, %c0_0] : memref<16x128xbf16, #tpu.memory_space<vmem>>, vector<16x128xbf16>
    %c0_1 = arith.constant 0 : index
    %c0_2 = arith.constant 0 : index
    %1 = vector.load %arg2[%c0_1, %c0_2] : memref<128x128xbf16, #tpu.memory_space<vmem>>, vector<128x128xbf16>
    %c0_3 = arith.constant 0 : index
    %c0_4 = arith.constant 0 : index
    %2 = vector.load %arg3[%c0_3, %c0_4] : memref<1x128xf32, #tpu.memory_space<vmem>>, vector<1x128xf32>
    %cst = arith.constant dense<0.000000e+00> : vector<16x128xf32>
    %3 = tpu.matmul %0, %1, %cst {dimension_numbers = #tpu.dot_dimension_numbers<[1], [0], [0], [1], [0, 0, 1, 1], [], []>} : vector<16x128xbf16>, vector<128x128xbf16>, vector<16x128xf32> -> vector<16x128xf32>
    %4 = vector.broadcast %2 : vector<1x128xf32> to vector<16x128xf32>
    %5 = arith.addf %3, %4 : vector<16x128xf32>
    %cst_5 = arith.constant 0.000000e+00 : f32
    %6 = vector.broadcast %cst_5 : f32 to vector<16x128xf32>
    %7 = arith.maximumf %5, %6 : vector<16x128xf32>
    %8 = arith.truncf %7 : vector<16x128xf32> to vector<16x128xbf16>
    %c0_6 = arith.constant 0 : index
    %c0_7 = arith.constant 0 : index
    %9 = vector.load %arg4[%c0_6, %c0_7] : memref<128x256xbf16, #tpu.memory_space<vmem>>, vector<128x256xbf16>
    %c0_8 = arith.constant 0 : index
    %c0_9 = arith.constant 0 : index
    %10 = vector.load %arg5[%c0_8, %c0_9] : memref<1x256xf32, #tpu.memory_space<vmem>>, vector<1x256xf32>
    %cst_10 = arith.constant dense<0.000000e+00> : vector<16x256xf32>
    %11 = tpu.matmul %8, %9, %cst_10 {dimension_numbers = #tpu.dot_dimension_numbers<[1], [0], [0], [1], [0, 0, 1, 1], [], []>} : vector<16x128xbf16>, vector<128x256xbf16>, vector<16x256xf32> -> vector<16x256xf32>
    %12 = vector.broadcast %10 : vector<1x256xf32> to vector<16x256xf32>
    %13 = arith.addf %11, %12 : vector<16x256xf32>
    %cst_11 = arith.constant 0.000000e+00 : f32
    %14 = vector.broadcast %cst_11 : f32 to vector<16x256xf32>
    %15 = arith.maximumf %13, %14 : vector<16x256xf32>
    %16 = arith.truncf %15 : vector<16x256xf32> to vector<16x256xbf16>
    %c0_12 = arith.constant 0 : index
    %c0_13 = arith.constant 0 : index
    %17 = vector.load %arg6[%c0_12, %c0_13] : memref<256x128xbf16, #tpu.memory_space<vmem>>, vector<256x128xbf16>
    %c0_14 = arith.constant 0 : index
    %c0_15 = arith.constant 0 : index
    %18 = vector.load %arg7[%c0_14, %c0_15] : memref<1x128xf32, #tpu.memory_space<vmem>>, vector<1x128xf32>
    %cst_16 = arith.constant dense<0.000000e+00> : vector<16x128xf32>
    %19 = tpu.matmul %16, %17, %cst_16 {dimension_numbers = #tpu.dot_dimension_numbers<[1], [0], [0], [1], [0, 0, 1, 1], [], []>} : vector<16x256xbf16>, vector<256x128xbf16>, vector<16x128xf32> -> vector<16x128xf32>
    %20 = vector.broadcast %18 : vector<1x128xf32> to vector<16x128xf32>
    %21 = arith.addf %19, %20 : vector<16x128xf32>
    %c0_17 = arith.constant 0 : index
    %c0_18 = arith.constant 0 : index
    %22 = vector.load %arg8[%c0_17, %c0_18] : memref<16x128xf32, #tpu.memory_space<vmem>>, vector<16x128xf32>
    tpu.vector_store %arg8[%c0_17, %c0_18], %21 {strides = array<i32>} : memref<16x128xf32, #tpu.memory_space<vmem>>, vector<16x128xf32>,
    return
  }
  func.func @transform_0(%arg0: i32) -> (i32, i32) {
    %c0_i32 = arith.constant 0 : i32
    %c0_i32_0 = arith.constant 0 : i32
    return %arg0, %c0_i32 : i32, i32
  }
  func.func @transform_1(%arg0: i32) -> (i32, i32) {
    %c0_i32 = arith.constant 0 : i32
    %c0_i32_0 = arith.constant 0 : i32
    %c0_i32_1 = arith.constant 0 : i32
    return %c0_i32, %c0_i32_0 : i32, i32
  }
  func.func @transform_2(%arg0: i32) -> (i32, i32) {
    %c0_i32 = arith.constant 0 : i32
    %c0_i32_0 = arith.constant 0 : i32
    %c0_i32_1 = arith.constant 0 : i32
    return %c0_i32, %c0_i32_0 : i32, i32
  }
  func.func @transform_3(%arg0: i32) -> (i32, i32) {
    %c0_i32 = arith.constant 0 : i32
    %c0_i32_0 = arith.constant 0 : i32
    %c0_i32_1 = arith.constant 0 : i32
    return %c0_i32, %c0_i32_0 : i32, i32
  }
  func.func @transform_4(%arg0: i32) -> (i32, i32) {
    %c0_i32 = arith.constant 0 : i32
    %c0_i32_0 = arith.constant 0 : i32
    %c0_i32_1 = arith.constant 0 : i32
    return %c0_i32, %c0_i32_0 : i32, i32
  }
  func.func @transform_5(%arg0: i32) -> (i32, i32) {
    %c0_i32 = arith.constant 0 : i32
    %c0_i32_0 = arith.constant 0 : i32
    %c0_i32_1 = arith.constant 0 : i32
    return %c0_i32, %c0_i32_0 : i32, i32
  }
  func.func @transform_6(%arg0: i32) -> (i32, i32) {
    %c0_i32 = arith.constant 0 : i32
    %c0_i32_0 = arith.constant 0 : i32
    %c0_i32_1 = arith.constant 0 : i32
    return %c0_i32, %c0_i32_0 : i32, i32
  }
  func.func @transform_7(%arg0: i32) -> (i32, i32) {
    %c0_i32 = arith.constant 0 : i32
    %c0_i32_0 = arith.constant 0 : i32
    return %arg0, %c0_i32 : i32, i32
  }
}

</mosaic_0001>

<bundles_post_ra>
// kernel: tpu_custom_call.1
= control target key start
LH: loop header
LB: loop body
LE: loop exit
PB: predicated region body
PF: predicated region fallthrough
CT: control target
= control target key end

     0   :  { %12 = vsyncpa [#allocation3], 0  ;;  %s976_s0 = inlined_call_operand.hbm [shape: bf16[16,128], index: 0, kind: input, shape index: {}]   ;;  %s977_s1 = inlined_call_operand.hbm [shape: bf16[128,128], index: 1, kind: input, shape index: {}]   ;;  %s978_s2 = inlined_call_operand.vmem [shape: f32[1,128], index: 2, kind: input, shape index: {}]   ;;  %s979_s3 = inlined_call_operand.hbm [shape: bf16[128,256], index: 3, kind: input, shape index: {}]   ;;  %s980_s4 = inlined_call_operand.vmem [shape: f32[1,256], index: 4, kind: input, shape index: {}]   ;;  %s981_s5 = inlined_call_operand.hbm [shape: bf16[256,128], index: 5, kind: input, shape index: {}]   ;;  %s982_s6 = inlined_call_operand.vmem [shape: f32[1,128], index: 6, kind: input, shape index: {}]   ;;  %s983_s7 = inlined_call_operand.hbm [shape: f32[16,128], index: 7, kind: output, shape index: {}]  }
   0x1   :  { %13 = vsyncpa [#allocation6], 0 }
   0x2   :  { %14 = vsyncpa [#allocation9], 0 }
   0x3   :  { %15 = vsyncpa [#allocation4], 0  ;;  %s833_s24 = smov [#allocation5]   ;;  %s834_s26 = smov [#allocation2]  }
   0x4   :  { %s33_s25 = sshll.u32 %s833_s24, 4  ;;  %s21_s27 = sshll.u32 %s834_s26, 4  ;;  %s34_s25 = int_to_ptr.vmem [resolvable:$true] %s33_s25  ;;  %s885_s27 = int_to_ptr.vmem [resolvable:$true] %s21_s27 }
   0x5   :  { %s715_s30 = scalar_lea.hbm %s977_s1, 1024 }
   0x6   :  { %p716_p0 = scmp.ne.s32.totalorder %s977_s1, %s715_s30  ;;  %p719_p1 = scmp.lt.u32.totalorder %s715_s30, %s977_s1 }
   0x8   :  { %p721_p2 = pnand %p719_p1, %p716_p0 }
   0xa   :  { %724 = shalt.err (!%p721_p2)
}
   0xb   :  { %s725_s12 = scalar_lea.vmem %s34_s25, 1024  ;;  %p730_p4 = scmp.lt.s32.totalorder %s34_s25, %s34_s25 }
   0xc   :  { %p726_p3 = scmp.ne.s32.totalorder %s34_s25, %s725_s12  ;;  %p731_p5 = scmp.lt.s32.totalorder %s725_s12, %s725_s12 }
   0xe   :  { %p732_p6 = por %p731_p5, %p730_p4 }
  0x10   :  { %p733_p7 = pnand %p732_p6, %p726_p3 }
  0x12   :  { %736 = shalt.err (!%p733_p7)
}
  0x13   :  { %s835_s13 = smov 64   ;;  %s836_s14 = smov 4  }
  0x14   :  { %39 = dma.hbm_to_vmem [thread:$0]  %s977_s1, 1024, %s34_s25, [#allocation6], %s835_s13, %s835_s13, %s836_s14  }
  0x15   :  { %s737_s19 = scalar_lea.hbm %s976_s0, 128 }
  0x16   :  { %p738_p8 = scmp.ne.s32.totalorder %s976_s0, %s737_s19  ;;  %p741_p9 = scmp.lt.u32.totalorder %s737_s19, %s976_s0 }
  0x18   :  { %p743_p10 = pnand %p741_p9, %p738_p8 }
  0x1a   :  { %746 = shalt.err (!%p743_p10)
}
  0x1b   :  { %s747_s24 = scalar_lea.vmem %s885_s27, 128  ;;  %p752_p12 = scmp.lt.s32.totalorder %s885_s27, %s885_s27 }
  0x1c   :  { %p748_p11 = scmp.ne.s32.totalorder %s885_s27, %s747_s24  ;;  %p753_p13 = scmp.lt.s32.totalorder %s747_s24, %s747_s24 }
  0x1e   :  { %p754_p0 = por %p753_p13, %p752_p12 }
  0x20   :  { %p755_p1 = pnand %p754_p0, %p748_p11 }
  0x22   :  { %758 = shalt.err (!%p755_p1)
}
  0x23   :  { %27 = dma.hbm_to_vmem [thread:$0]  %s976_s0, 128, %s885_s27, [#allocation3], %s835_s13, %s835_s13, %s836_s14  }
  0x24   :  { %s837_s26 = smov [#allocation7]   ;;  %s759_s8 = scalar_lea.hbm %s979_s3, 2048 }
  0x25   :  { %s47_s28 = sshll.u32 %s837_s26, 4  ;;  %p760_p2 = scmp.ne.s32.totalorder %s979_s3, %s759_s8  ;;  %s48_s28 = int_to_ptr.vmem [resolvable:$true] %s47_s28 }
  0x26   :  { %p763_p3 = scmp.lt.u32.totalorder %s759_s8, %s979_s3 }
  0x28   :  { %p765_p4 = pnand %p763_p3, %p760_p2 }
  0x2a   :  { %768 = shalt.err (!%p765_p4)
}
  0x2b   :  { %s769_s15 = scalar_lea.vmem %s48_s28, 2048  ;;  %p774_p6 = scmp.lt.s32.totalorder %s48_s28, %s48_s28 }
  0x2c   :  { %p770_p5 = scmp.ne.s32.totalorder %s48_s28, %s769_s15  ;;  %p775_p7 = scmp.lt.s32.totalorder %s769_s15, %s769_s15 }
  0x2e   :  { %p776_p8 = por %p775_p7, %p774_p6 }
  0x30   :  { %p777_p9 = pnand %p776_p8, %p770_p5 }
  0x32   :  { %780 = shalt.err (!%p777_p9)
}
  0x33   :  { %s838_s0 = smov 128   ;;  %s839_s27 = smov 8  }
  0x34   :  { %53 = dma.hbm_to_vmem [thread:$0]  %s979_s3, 2048, %s48_s28, [#allocation6], %s838_s0, %s838_s0, %s839_s27  }
  0x35   :  { %s840_s18 = smov [#allocation8]   ;;  %s781_s22 = scalar_lea.hbm %s981_s5, 2048 }
  0x36   :  { %s61_s19 = sshll.u32 %s840_s18, 4  ;;  %p782_p10 = scmp.ne.s32.totalorder %s981_s5, %s781_s22  ;;  %s62_s19 = int_to_ptr.vmem [resolvable:$true] %s61_s19 }
  0x37   :  { %p785_p11 = scmp.lt.u32.totalorder %s781_s22, %s981_s5 }
  0x39   :  { %p787_p12 = pnand %p785_p11, %p782_p10 }
  0x3b   :  { %790 = shalt.err (!%p787_p12)
}
  0x3c   :  { %s791_s26 = scalar_lea.vmem %s62_s19, 2048  ;;  %p796_p0 = scmp.lt.s32.totalorder %s62_s19, %s62_s19 }
  0x3d   :  { %p792_p13 = scmp.ne.s32.totalorder %s62_s19, %s791_s26  ;;  %p797_p1 = scmp.lt.s32.totalorder %s791_s26, %s791_s26 }
  0x3f   :  { %p798_p2 = por %p797_p1, %p796_p0 }
  0x41   :  { %p799_p3 = pnand %p798_p2, %p792_p13 }
  0x43   :  { %802 = shalt.err (!%p799_p3)
}
  0x44   :  { %67 = dma.hbm_to_vmem [thread:$0]  %s981_s5, 2048, %s62_s19, [#allocation9], %s835_s13, %s835_s13, %s836_s14  }
  0x45   :  { %825 = dma.done.wait [#allocation3], 128  }
  0x46   :  { %826 = vsyncadd [#allocation3], 4294967168 }
  0x47   :  { %827 = dma.done.wait [#allocation6], 3072  }
  0x48   :  { %828 = vsyncadd [#allocation6], 4294964224 }
  0x49   :  { %829 = dma.done.wait [#allocation9], 2048  }
  0x4a   :  { %830 = vsyncadd [#allocation9], 4294965248  ;;  %v841_v0 = vmov 0.0   ;;  %vm842_vm0 = vmmov 0   ;;  %v666_v1 = vld [vmem:[#allocation5] sm:$0xff]   ;;  %v667_v2 = vld [vmem:[#allocation5 + $0x8] sm:$0xff]   ;;  %v224_v53 = vlaneseq }
  0x4b   :  { %634 = vmatprep.subr.bf16.mxu0 %v841_v0  ;;  %650 = vmatprep.mubr.msk.bf16.mxu0 %vm842_vm0, %v841_v0  ;;  %v668_v3 = vld [vmem:[#allocation5 + $0x10] sm:$0xff]   ;;  %v669_v4 = vld [vmem:[#allocation5 + $0x18] sm:$0xff]   ;;  %v675_v5 = vld [vmem:[#allocation7 + $0x4] ss:$8 sps:$4 sm:$0xff]   ;;  %v843_v26 = vmov 0   ;;  %s844_s30 = smov [#allocation10]  }
  0x4c   :  { %635 = vmatpush3.bf16.msra.mxu0 %v666_v1  ;;  %v677_v6 = vld [vmem:[#allocation7] ss:$8 sps:$4 sm:$0xff]   ;;  %314 = vmatprep.subr.bf16.mxu1 %v675_v5  ;;  %v678_v7 = vld [vmem:[#allocation7 + $0x14] ss:$8 sps:$4 sm:$0xff]   ;;  %v680_v8 = vld [vmem:[#allocation7 + $0x10] ss:$8 sps:$4 sm:$0xff]  }
  0x4d   :  { %636 = vmatprep.subr.bf16.mxu0 %v841_v0  ;;  %315 = vmatpush1.bf16.msra.mxu1 %v677_v6  ;;  %v681_v9 = vld [vmem:[#allocation7 + $0x24] ss:$8 sps:$4 sm:$0xff]   ;;  %v683_v12 = vld [vmem:[#allocation7 + $0x20] ss:$8 sps:$4 sm:$0xff]   ;;  %v684_v13 = vld [vmem:[#allocation7 + $0x34] ss:$8 sps:$4 sm:$0xff]  }
  0x4e   :  { %316 = vmatprep.subr.bf16.mxu1 %v678_v7  ;;  %v670_v10 = vld [vmem:[#allocation5 + $0x20] sm:$0xff]   ;;  %v671_v11 = vld [vmem:[#allocation5 + $0x28] sm:$0xff]   ;;  %v686_v14 = vld [vmem:[#allocation7 + $0x30] ss:$8 sps:$4 sm:$0xff]   ;;  %346 = vmatprep.mubr.bf16.mxu1 %v843_v26  ;;  %v225_v54 = vshrl.u32 %v224_v53, 7  ;;  %s546_s8 = sshll.u32 %s844_s30, 4  ;;  %s547_s8 = int_to_ptr.vmem [resolvable:$true] %s546_s8 }
  0x4f   :  { %v687_v15 = vld [vmem:[#allocation7 + $0x44] ss:$8 sps:$4 sm:$0xff]   ;;  %v672_v16 = vld [vmem:[#allocation5 + $0x30] sm:$0xff]   ;;  %v689_v17 = vld [vmem:[#allocation7 + $0x40] ss:$8 sps:$4 sm:$0xff]   ;;  %s803_s9 = scalar_lea.vmem %s547_s8, 256  ;;  %p808_p5 = scmp.lt.s32.totalorder %s547_s8, %s547_s8 }
  0x50   :  { %637 = vmatpush3.bf16.msra.mxu0 %v667_v2  ;;  %v690_v18 = vld [vmem:[#allocation7 + $0x54] ss:$8 sps:$4 sm:$0xff]   ;;  %v692_v20 = vld [vmem:[#allocation7 + $0x50] ss:$8 sps:$4 sm:$0xff]   ;;  %v693_v22 = vld [vmem:[#allocation7 + $0x64] ss:$8 sps:$4 sm:$0xff]   ;;  %p804_p4 = scmp.ne.s32.totalorder %s547_s8, %s803_s9  ;;  %p809_p6 = scmp.lt.s32.totalorder %s803_s9, %s803_s9 }
  0x51   :  { %638 = vmatprep.subr.bf16.mxu0 %v841_v0  ;;  %317 = vmatpush1.bf16.msra.mxu1 %v680_v8  ;;  %v673_v19 = vld [vmem:[#allocation5 + $0x38] sm:$0xff]   ;;  %v695_v23 = vld [vmem:[#allocation7 + $0x60] ss:$8 sps:$4 sm:$0xff]   ;;  %v703_v31 = vld [vmem:[#allocation8 + $0x50] sm:$0xff]   ;;  %v226_v55 = vsub.s32 0, %v225_v54  ;;  %v230_v57 = vsub.s32 1, %v225_v54 }
  0x52   :  { %318 = vmatprep.subr.bf16.mxu1 %v681_v9  ;;  %v674_v21 = vld [vmem:[#allocation2] sm:$0xff]   ;;  %v699_v27 = vld [vmem:[#allocation8 + $0x40] sm:$0xff]   ;;  %v701_v29 = vld [vmem:[#allocation8 + $0x48] sm:$0xff]   ;;  %p810_p7 = por %p809_p6, %p808_p5 }
  0x53   :  { %v696_v24 = vld [vmem:[#allocation7 + $0x74] ss:$8 sps:$4 sm:$0xff]   ;;  %v698_v25 = vld [vmem:[#allocation7 + $0x70] ss:$8 sps:$4 sm:$0xff]   ;;  %v700_v28 = vld [vmem:[#allocation8] sm:$0xff]  }
  0x54   :  { %639 = vmatpush3.bf16.msra.mxu0 %v668_v3  ;;  %v702_v30 = vld [vmem:[#allocation8 + $0x8] sm:$0xff]   ;;  %v704_v32 = vld [vmem:[#allocation8 + $0x10] sm:$0xff]   ;;  %v705_v33 = vld [vmem:[#allocation8 + $0x58] sm:$0xff]   ;;  %p811_p8 = pnand %p810_p7, %p804_p4 }
  0x55   :  { %640 = vmatprep.subr.bf16.mxu0 %v841_v0  ;;  %319 = vmatpush1.bf16.msra.mxu1 %v683_v12  ;;  %v706_v34 = vld [vmem:[#allocation8 + $0x18] sm:$0xff]   ;;  %v707_v35 = vld [vmem:[#allocation8 + $0x60] sm:$0xff]   ;;  %v709_v37 = vld [vmem:[#allocation8 + $0x68] sm:$0xff]  }
  0x56   :  { %320 = vmatprep.subr.bf16.mxu1 %v684_v13  ;;  %v708_v36 = vld [vmem:[#allocation8 + $0x20] sm:$0xff]   ;;  %v560_v38 = vld [vmem:[%s978_s2] ss:$0 sm:$0xff]  ;;  %v710_v48 = vld [vmem:[#allocation8 + $0x28] sm:$0xff]  }
  0x57   :  { %v711_v49 = vld [vmem:[#allocation8 + $0x70] sm:$0xff]   ;;  %v713_v51 = vld [vmem:[#allocation8 + $0x78] sm:$0xff]  }
  0x58   :  { %641 = vmatpush3.bf16.msra.mxu0 %v669_v4  ;;  %v712_v50 = vld [vmem:[#allocation8 + $0x30] sm:$0xff]   ;;  %v714_v52 = vld [vmem:[#allocation8 + $0x38] sm:$0xff]  }
  0x59   :  { %642 = vmatprep.subr.bf16.mxu0 %v841_v0  ;;  %321 = vmatpush1.bf16.msra.mxu1 %v686_v14  ;;  %v222_v56 = vld [vmem:[%s980_s4] sm:$0x3] }
  0x5a   :  { %322 = vmatprep.subr.bf16.mxu1 %v687_v15  ;;  %v227_v58 = vrot.slane %v222_v56, %v226_v55  ;;  %v231_v59 = vrot.slane %v222_v56, %v230_v57 }
  0x5c   :  { %643 = vmatpush3.bf16.msra.mxu0 %v670_v10 }
  0x5d   :  { %644 = vmatprep.subr.bf16.mxu0 %v841_v0  ;;  %323 = vmatpush1.bf16.msra.mxu1 %v689_v17 }
  0x5e   :  { %324 = vmatprep.subr.bf16.mxu1 %v690_v18 }
  0x60   :  { %645 = vmatpush3.bf16.msra.mxu0 %v671_v11  ;;  %v586_v11 = vld [vmem:[%s982_s6] ss:$0 sm:$0xff] }
  0x61   :  { %646 = vmatprep.subr.bf16.mxu0 %v841_v0  ;;  %325 = vmatpush1.bf16.msra.mxu1 %v692_v20 }
  0x62   :  { %326 = vmatprep.subr.bf16.mxu1 %v693_v22 }
  0x64   :  { %647 = vmatpush3.bf16.msra.mxu0 %v672_v16 }
  0x65   :  { %648 = vmatprep.subr.bf16.mxu0 %v841_v0  ;;  %327 = vmatpush1.bf16.msra.mxu1 %v695_v23 }
  0x66   :  { %328 = vmatprep.subr.bf16.mxu1 %v696_v24 }
  0x68   :  { %649 = vmatpush3.bf16.msra.mxu0 %v673_v19 }
  0x69   :  { %329 = vmatpush1.bf16.msra.mxu1 %v698_v25  ;;  %612 = vmatprep.subr.bf16.mxu0 %v699_v27 }
  0x6b   :  { %651 = vmatmul.mubr.bf16.vlgmr.msra.gmra.mrb[0].mxu0 %v674_v21 }
  0x6c   :  { %613 = vmatpush3.bf16.msra.mxu0 %v700_v28 }
  0x6d   :  { %614 = vmatprep.subr.bf16.mxu0 %v701_v29 }
  0x70   :  { %615 = vmatpush3.bf16.msra.mxu0 %v702_v30 }
  0x71   :  { %616 = vmatprep.subr.bf16.mxu0 %v703_v31 }
  0x74   :  { %617 = vmatpush3.bf16.msra.mxu0 %v704_v32 }
  0x75   :  { %618 = vmatprep.subr.bf16.mxu0 %v705_v33 }
  0x78   :  { %619 = vmatpush3.bf16.msra.mxu0 %v706_v34 }
  0x79   :  { %620 = vmatprep.subr.bf16.mxu0 %v707_v35 }
  0x7c   :  { %621 = vmatpush3.bf16.msra.mxu0 %v708_v36 }
  0x7d   :  { %622 = vmatprep.subr.bf16.mxu0 %v709_v37 }
  0x80   :  { %623 = vmatpush3.bf16.msra.mxu0 %v710_v48 }
  0x81   :  { %624 = vmatprep.subr.bf16.mxu0 %v711_v49 }
  0x84   :  { %625 = vmatpush3.bf16.msra.mxu0 %v712_v50 }
  0x85   :  { %626 = vmatprep.subr.bf16.mxu0 %v713_v51 }
  0x88   :  { %627 = vmatpush3.bf16.msra.mxu0 %v714_v52 }
 0x13e   :  { %v196_v39 = vpop.f32.mrb[0].mxu0 }
 0x13f   :  { %v197_v40 = vadd.f32 %v560_v38, %v196_v39  ;;  %v652_v41 = vpop.f32.mrb[1].mxu0 }
 0x140   :  { %v199_v42 = vpop.f32.mrb[2].mxu0 }
 0x141   :  { %v200_v43 = vadd.f32 %v560_v38, %v199_v42  ;;  %v653_v44 = vpop.f32.mrb[3].mxu0  ;;  %v203_v45 = vmax.f32 %v197_v40, 0.0 }
 0x143   :  { %v204_v46 = vmax.f32 %v200_v43, 0.0 }
 0x145   :  { %v205_v47 = vpack.c.bf16 %v204_v46, %v203_v45 }
 0x147   :  { %347 = vmatmul.mubr.bf16.vlgmr.msra.gmra.mrb[0].mxu1 %v205_v47 }
 0x21a   :  { %v348_v60 = vpop.f32.mrb[0].mxu1 }
 0x21b   :  { %v349_v61 = vadd.f32 %v348_v60, %v227_v58  ;;  %v350_v62 = vpop.f32.mrb[1].mxu1 }
 0x21c   :  { %v351_v63 = vadd.f32 %v350_v62, %v231_v59  ;;  %v352_v0 = vpop.f32.mrb[2].mxu1 }
 0x21d   :  { %v353_v1 = vadd.f32 %v352_v0, %v227_v58  ;;  %v354_v2 = vpop.f32.mrb[3].mxu1  ;;  %v357_v4 = vmax.f32 %v349_v61, 0.0 }
 0x21e   :  { %v355_v3 = vadd.f32 %v354_v2, %v231_v59  ;;  %v358_v6 = vmax.f32 %v351_v63, 0.0 }
 0x21f   :  { %v359_v5 = vmax.f32 %v353_v1, 0.0 }
 0x220   :  { %v360_v7 = vmax.f32 %v355_v3, 0.0 }
 0x221   :  { %v361_v8 = vpack.c.bf16 %v359_v5, %v357_v4 }
 0x222   :  { %v362_v9 = vpack.c.bf16 %v360_v7, %v358_v6 }
 0x224   :  { %530 = vmatprep.mubr.bf16.mxu0 %v362_v9 }
 0x225   :  { %531 = vmatmul.mubr.bf16.vlgmr.msra.gmra.mrb[4].mxu0 %v361_v8 }
 0x2f8   :  { %v628_v10 = vpop.f32.mrb[4].mxu0 }
 0x2f9   :  { %v629_v12 = vpop.f32.mrb[5].mxu0 }
 0x2fa   :  { %v630_v13 = vadd.f32 %v629_v12, %v628_v10  ;;  %v631_v14 = vpop.f32.mrb[6].mxu0 }
 0x2fb   :  { %v632_v15 = vpop.f32.mrb[7].mxu0 }
 0x2fc   :  { %v533_v16 = vadd.f32 %v630_v13, %v586_v11  ;;  %v633_v17 = vadd.f32 %v632_v15, %v631_v14 }
 0x2fe   :  { %539 = vst [vmem:[#allocation10] sm:$0xff] %v533_v16  ;;  %v536_v18 = vadd.f32 %v633_v17, %v586_v11 }
 0x300   :  { %540 = vst [vmem:[#allocation10 + $0x8] sm:$0xff] %v536_v18 }
 0x301   :  { %814 = shalt.err (!%p811_p8)
}
 0x302   :  { %s815_s11 = scalar_lea.hbm %s983_s7, 256 }
 0x303   :  { %p816_p9 = scmp.ne.s32.totalorder %s983_s7, %s815_s11  ;;  %p819_p10 = scmp.lt.u32.totalorder %s815_s11, %s983_s7 }
 0x305   :  { %p821_p11 = pnand %p819_p10, %p816_p9 }
 0x307   :  { %824 = shalt.err (!%p821_p11)
}
 0x308   :  { %552 = dma.vmem_to_hbm [thread:$0]  %s547_s8, 256, %s983_s7, [#allocation4], %s838_s0, %s838_s0, %s839_s27  }
 0x309   :  { %831 = dma.done.wait [#allocation4], 256  }
 0x30a   :  { %832 = vsyncadd [#allocation4], 4294967040 }
 0x30b   :  { %556 = vsyncpa [#allocation3], 1 }
 0x30c   :  { %557 = vsyncpa [#allocation6], 1 }
 0x30d   :  { %558 = vsyncpa [#allocation9], 1 }
 0x30e   :  { %559 = vsyncpa [#allocation4], 1 }

// kernel: tpu_custom_call.1
= control target key start
LH: loop header
LB: loop body
LE: loop exit
PB: predicated region body
PF: predicated region fallthrough
CT: control target
= control target key end

     0   :  { %12 = vsyncpa [#allocation3], 0  ;;  %s976_s0 = inlined_call_operand.hbm [shape: bf16[16,128], index: 0, kind: input, shape index: {}]   ;;  %s977_s1 = inlined_call_operand.hbm [shape: bf16[128,128], index: 1, kind: input, shape index: {}]   ;;  %s978_s2 = inlined_call_operand.vmem [shape: f32[1,128], index: 2, kind: input, shape index: {}]   ;;  %s979_s3 = inlined_call_operand.hbm [shape: bf16[128,256], index: 3, kind: input, shape index: {}]   ;;  %s980_s4 = inlined_call_operand.vmem [shape: f32[1,256], index: 4, kind: input, shape index: {}]   ;;  %s981_s5 = inlined_call_operand.hbm [shape: bf16[256,128], index: 5, kind: input, shape index: {}]   ;;  %s982_s6 = inlined_call_operand.vmem [shape: f32[1,128], index: 6, kind: input, shape index: {}]   ;;  %s983_s7 = inlined_call_operand.hbm [shape: f32[16,128], index: 7, kind: output, shape index: {}]  }
   0x1   :  { %13 = vsyncpa [#allocation6], 0 }
   0x2   :  { %14 = vsyncpa [#allocation9], 0 }
   0x3   :  { %15 = vsyncpa [#allocation4], 0  ;;  %s833_s24 = smov [#allocation5]   ;;  %s834_s26 = smov [#allocation2]  }
   0x4   :  { %s33_s25 = sshll.u32 %s833_s24, 4  ;;  %s21_s27 = sshll.u32 %s834_s26, 4  ;;  %s34_s25 = int_to_ptr.vmem [resolvable:$true] %s33_s25  ;;  %s885_s27 = int_to_ptr.vmem [resolvable:$true] %s21_s27 }
   0x5   :  { %s715_s30 = scalar_lea.hbm %s977_s1, 1024 }
   0x6   :  { %p716_p0 = scmp.ne.s32.totalorder %s977_s1, %s715_s30  ;;  %p719_p1 = scmp.lt.u32.totalorder %s715_s30, %s977_s1 }
   0x8   :  { %p721_p2 = pnand %p719_p1, %p716_p0 }
   0xa   :  { %724 = shalt.err (!%p721_p2)
}
   0xb   :  { %s725_s12 = scalar_lea.vmem %s34_s25, 1024  ;;  %p730_p4 = scmp.lt.s32.totalorder %s34_s25, %s34_s25 }
   0xc   :  { %p726_p3 = scmp.ne.s32.totalorder %s34_s25, %s725_s12  ;;  %p731_p5 = scmp.lt.s32.totalorder %s725_s12, %s725_s12 }
   0xe   :  { %p732_p6 = por %p731_p5, %p730_p4 }
  0x10   :  { %p733_p7 = pnand %p732_p6, %p726_p3 }
  0x12   :  { %736 = shalt.err (!%p733_p7)
}
  0x13   :  { %s835_s13 = smov 64   ;;  %s836_s14 = smov 4  }
  0x14   :  { %39 = dma.hbm_to_vmem [thread:$0]  %s977_s1, 1024, %s34_s25, [#allocation6], %s835_s13, %s835_s13, %s836_s14  }
  0x15   :  { %s737_s19 = scalar_lea.hbm %s976_s0, 128 }
  0x16   :  { %p738_p8 = scmp.ne.s32.totalorder %s976_s0, %s737_s19  ;;  %p741_p9 = scmp.lt.u32.totalorder %s737_s19, %s976_s0 }
  0x18   :  { %p743_p10 = pnand %p741_p9, %p738_p8 }
  0x1a   :  { %746 = shalt.err (!%p743_p10)
}
  0x1b   :  { %s747_s24 = scalar_lea.vmem %s885_s27, 128  ;;  %p752_p12 = scmp.lt.s32.totalorder %s885_s27, %s885_s27 }
  0x1c   :  { %p748_p11 = scmp.ne.s32.totalorder %s885_s27, %s747_s24  ;;  %p753_p13 = scmp.lt.s32.totalorder %s747_s24, %s747_s24 }
  0x1e   :  { %p754_p0 = por %p753_p13, %p752_p12 }
  0x20   :  { %p755_p1 = pnand %p754_p0, %p748_p11 }
  0x22   :  { %758 = shalt.err (!%p755_p1)
}
  0x23   :  { %27 = dma.hbm_to_vmem [thread:$0]  %s976_s0, 128, %s885_s27, [#allocation3], %s835_s13, %s835_s13, %s836_s14  }
  0x24   :  { %s837_s26 = smov [#allocation7]   ;;  %s759_s8 = scalar_lea.hbm %s979_s3, 2048 }
  0x25   :  { %s47_s28 = sshll.u32 %s837_s26, 4  ;;  %p760_p2 = scmp.ne.s32.totalorder %s979_s3, %s759_s8  ;;  %s48_s28 = int_to_ptr.vmem [resolvable:$true] %s47_s28 }
  0x26   :  { %p763_p3 = scmp.lt.u32.totalorder %s759_s8, %s979_s3 }
  0x28   :  { %p765_p4 = pnand %p763_p3, %p760_p2 }
  0x2a   :  { %768 = shalt.err (!%p765_p4)
}
  0x2b   :  { %s769_s15 = scalar_lea.vmem %s48_s28, 2048  ;;  %p774_p6 = scmp.lt.s32.totalorder %s48_s28, %s48_s28 }
  0x2c   :  { %p770_p5 = scmp.ne.s32.totalorder %s48_s28, %s769_s15  ;;  %p775_p7 = scmp.lt.s32.totalorder %s769_s15, %s769_s15 }
  0x2e   :  { %p776_p8 = por %p775_p7, %p774_p6 }
  0x30   :  { %p777_p9 = pnand %p776_p8, %p770_p5 }
  0x32   :  { %780 = shalt.err (!%p777_p9)
}
  0x33   :  { %s838_s0 = smov 128   ;;  %s839_s27 = smov 8  }
  0x34   :  { %53 = dma.hbm_to_vmem [thread:$0]  %s979_s3, 2048, %s48_s28, [#allocation6], %s838_s0, %s838_s0, %s839_s27  }
  0x35   :  { %s840_s18 = smov [#allocation8]   ;;  %s781_s22 = scalar_lea.hbm %s981_s5, 2048 }
  0x36   :  { %s61_s19 = sshll.u32 %s840_s18, 4  ;;  %p782_p10 = scmp.ne.s32.totalorder %s981_s5, %s781_s22  ;;  %s62_s19 = int_to_ptr.vmem [resolvable:$true] %s61_s19 }
  0x37   :  { %p785_p11 = scmp.lt.u32.totalorder %s781_s22, %s981_s5 }
  0x39   :  { %p787_p12 = pnand %p785_p11, %p782_p10 }
  0x3b   :  { %790 = shalt.err (!%p787_p12)
}
  0x3c   :  { %s791_s26 = scalar_lea.vmem %s62_s19, 2048  ;;  %p796_p0 = scmp.lt.s32.totalorder %s62_s19, %s62_s19 }
  0x3d   :  { %p792_p13 = scmp.ne.s32.totalorder %s62_s19, %s791_s26  ;;  %p797_p1 = scmp.lt.s32.totalorder %s791_s26, %s791_s26 }
  0x3f   :  { %p798_p2 = por %p797_p1, %p796_p0 }
  0x41   :  { %p799_p3 = pnand %p798_p2, %p792_p13 }
  0x43   :  { %802 = shalt.err (!%p799_p3)
}
  0x44   :  { %67 = dma.hbm_to_vmem [thread:$0]  %s981_s5, 2048, %s62_s19, [#allocation9], %s835_s13, %s835_s13, %s836_s14  }
  0x45   :  { %825 = dma.done.wait [#allocation3], 128  }
  0x46   :  { %826 = vsyncadd [#allocation3], 4294967168 }
  0x47   :  { %827 = dma.done.wait [#allocation6], 3072  }
  0x48   :  { %828 = vsyncadd [#allocation6], 4294964224 }
  0x49   :  { %829 = dma.done.wait [#allocation9], 2048  }
  0x4a   :  { %830 = vsyncadd [#allocation9], 4294965248  ;;  %v841_v0 = vmov 0.0   ;;  %vm842_vm0 = vmmov 0   ;;  %v666_v1 = vld [vmem:[#allocation5] sm:$0xff]   ;;  %v667_v2 = vld [vmem:[#allocation5 + $0x8] sm:$0xff]   ;;  %v224_v53 = vlaneseq }
  0x4b   :  { %634 = vmatprep.subr.bf16.mxu0 %v841_v0  ;;  %650 = vmatprep.mubr.msk.bf16.mxu0 %vm842_vm0, %v841_v0  ;;  %v668_v3 = vld [vmem:[#allocation5 + $0x10] sm:$0xff]   ;;  %v669_v4 = vld [vmem:[#allocation5 + $0x18] sm:$0xff]   ;;  %v675_v5 = vld [vmem:[#allocation7 + $0x4] ss:$8 sps:$4 sm:$0xff]   ;;  %v843_v26 = vmov 0   ;;  %s844_s30 = smov [#allocation10]  }
  0x4c   :  { %635 = vmatpush3.bf16.msra.mxu0 %v666_v1  ;;  %v677_v6 = vld [vmem:[#allocation7] ss:$8 sps:$4 sm:$0xff]   ;;  %314 = vmatprep.subr.bf16.mxu1 %v675_v5  ;;  %v678_v7 = vld [vmem:[#allocation7 + $0x14] ss:$8 sps:$4 sm:$0xff]   ;;  %v680_v8 = vld [vmem:[#allocation7 + $0x10] ss:$8 sps:$4 sm:$0xff]  }
  0x4d   :  { %636 = vmatprep.subr.bf16.mxu0 %v841_v0  ;;  %315 = vmatpush1.bf16.msra.mxu1 %v677_v6  ;;  %v681_v9 = vld [vmem:[#allocation7 + $0x24] ss:$8 sps:$4 sm:$0xff]   ;;  %v683_v12 = vld [vmem:[#allocation7 + $0x20] ss:$8 sps:$4 sm:$0xff]   ;;  %v684_v13 = vld [vmem:[#allocation7 + $0x34] ss:$8 sps:$4 sm:$0xff]  }
  0x4e   :  { %316 = vmatprep.subr.bf16.mxu1 %v678_v7  ;;  %v670_v10 = vld [vmem:[#allocation5 + $0x20] sm:$0xff]   ;;  %v671_v11 = vld [vmem:[#allocation5 + $0x28] sm:$0xff]   ;;  %v686_v14 = vld [vmem:[#allocation7 + $0x30] ss:$8 sps:$4 sm:$0xff]   ;;  %346 = vmatprep.mubr.bf16.mxu1 %v843_v26  ;;  %v225_v54 = vshrl.u32 %v224_v53, 7  ;;  %s546_s8 = sshll.u32 %s844_s30, 4  ;;  %s547_s8 = int_to_ptr.vmem [resolvable:$true] %s546_s8 }
  0x4f   :  { %v687_v15 = vld [vmem:[#allocation7 + $0x44] ss:$8 sps:$4 sm:$0xff]   ;;  %v672_v16 = vld [vmem:[#allocation5 + $0x30] sm:$0xff]   ;;  %v689_v17 = vld [vmem:[#allocation7 + $0x40] ss:$8 sps:$4 sm:$0xff]   ;;  %s803_s9 = scalar_lea.vmem %s547_s8, 256  ;;  %p808_p5 = scmp.lt.s32.totalorder %s547_s8, %s547_s8 }
  0x50   :  { %637 = vmatpush3.bf16.msra.mxu0 %v667_v2  ;;  %v690_v18 = vld [vmem:[#allocation7 + $0x54] ss:$8 sps:$4 sm:$0xff]   ;;  %v692_v20 = vld [vmem:[#allocation7 + $0x50] ss:$8 sps:$4 sm:$0xff]   ;;  %v693_v22 = vld [vmem:[#allocation7 + $0x64] ss:$8 sps:$4 sm:$0xff]   ;;  %p804_p4 = scmp.ne.s32.totalorder %s547_s8, %s803_s9  ;;  %p809_p6 = scmp.lt.s32.totalorder %s803_s9, %s803_s9 }
  0x51   :  { %638 = vmatprep.subr.bf16.mxu0 %v841_v0  ;;  %317 = vmatpush1.bf16.msra.mxu1 %v680_v8  ;;  %v673_v19 = vld [vmem:[#allocation5 + $0x38] sm:$0xff]   ;;  %v695_v23 = vld [vmem:[#allocation7 + $0x60] ss:$8 sps:$4 sm:$0xff]   ;;  %v703_v31 = vld [vmem:[#allocation8 + $0x50] sm:$0xff]   ;;  %v226_v55 = vsub.s32 0, %v225_v54  ;;  %v230_v57 = vsub.s32 1, %v225_v54 }
  0x52   :  { %318 = vmatprep.subr.bf16.mxu1 %v681_v9  ;;  %v674_v21 = vld [vmem:[#allocation2] sm:$0xff]   ;;  %v699_v27 = vld [vmem:[#allocation8 + $0x40] sm:$0xff]   ;;  %v701_v29 = vld [vmem:[#allocation8 + $0x48] sm:$0xff]   ;;  %p810_p7 = por %p809_p6, %p808_p5 }
  0x53   :  { %v696_v24 = vld [vmem:[#allocation7 + $0x74] ss:$8 sps:$4 sm:$0xff]   ;;  %v698_v25 = vld [vmem:[#allocation7 + $0x70] ss:$8 sps:$4 sm:$0xff]   ;;  %v700_v28 = vld [vmem:[#allocation8] sm:$0xff]  }
  0x54   :  { %639 = vmatpush3.bf16.msra.mxu0 %v668_v3  ;;  %v702_v30 = vld [vmem:[#allocation8 + $0x8] sm:$0xff]   ;;  %v704_v32 = vld [vmem:[#allocation8 + $0x10] sm:$0xff]   ;;  %v705_v33 = vld [vmem:[#allocation8 + $0x58] sm:$0xff]   ;;  %p811_p8 = pnand %p810_p7, %p804_p4 }
  0x55   :  { %640 = vmatprep.subr.bf16.mxu0 %v841_v0  ;;  %319 = vmatpush1.bf16.msra.mxu1 %v683_v12  ;;  %v706_v34 = vld [vmem:[#allocation8 + $0x18] sm:$0xff]   ;;  %v707_v35 = vld [vmem:[#allocation8 + $0x60] sm:$0xff]   ;;  %v709_v37 = vld [vmem:[#allocation8 + $0x68] sm:$0xff]  }
  0x56   :  { %320 = vmatprep.subr.bf16.mxu1 %v684_v13  ;;  %v708_v36 = vld [vmem:[#allocation8 + $0x20] sm:$0xff]   ;;  %v560_v38 = vld [vmem:[%s978_s2] ss:$0 sm:$0xff]  ;;  %v710_v48 = vld [vmem:[#allocation8 + $0x28] sm:$0xff]  }
  0x57   :  { %v711_v49 = vld [vmem:[#allocation8 + $0x70] sm:$0xff]   ;;  %v713_v51 = vld [vmem:[#allocation8 + $0x78] sm:$0xff]  }
  0x58   :  { %641 = vmatpush3.bf16.msra.mxu0 %v669_v4  ;;  %v712_v50 = vld [vmem:[#allocation8 + $0x30] sm:$0xff]   ;;  %v714_v52 = vld [vmem:[#allocation8 + $0x38] sm:$0xff]  }
  0x59   :  { %642 = vmatprep.subr.bf16.mxu0 %v841_v0  ;;  %321 = vmatpush1.bf16.msra.mxu1 %v686_v14  ;;  %v222_v56 = vld [vmem:[%s980_s4] sm:$0x3] }
  0x5a   :  { %322 = vmatprep.subr.bf16.mxu1 %v687_v15  ;;  %v227_v58 = vrot.slane %v222_v56, %v226_v55  ;;  %v231_v59 = vrot.slane %v222_v56, %v230_v57 }
  0x5c   :  { %643 = vmatpush3.bf16.msra.mxu0 %v670_v10 }
  0x5d   :  { %644 = vmatprep.subr.bf16.mxu0 %v841_v0  ;;  %323 = vmatpush1.bf16.msra.mxu1 %v689_v17 }
  0x5e   :  { %324 = vmatprep.subr.bf16.mxu1 %v690_v18 }
  0x60   :  { %645 = vmatpush3.bf16.msra.mxu0 %v671_v11  ;;  %v586_v11 = vld [vmem:[%s982_s6] ss:$0 sm:$0xff] }
  0x61   :  { %646 = vmatprep.subr.bf16.mxu0 %v841_v0  ;;  %325 = vmatpush1.bf16.msra.mxu1 %v692_v20 }
  0x62   :  { %326 = vmatprep.subr.bf16.mxu1 %v693_v22 }
  0x64   :  { %647 = vmatpush3.bf16.msra.mxu0 %v672_v16 }
  0x65   :  { %648 = vmatprep.subr.bf16.mxu0 %v841_v0  ;;  %327 = vmatpush1.bf16.msra.mxu1 %v695_v23 }
  0x66   :  { %328 = vmatprep.subr.bf16.mxu1 %v696_v24 }
  0x68   :  { %649 = vmatpush3.bf16.msra.mxu0 %v673_v19 }
  0x69   :  { %329 = vmatpush1.bf16.msra.mxu1 %v698_v25  ;;  %612 = vmatprep.subr.bf16.mxu0 %v699_v27 }
  0x6b   :  { %651 = vmatmul.mubr.bf16.vlgmr.msra.gmra.mrb[0].mxu0 %v674_v21 }
  0x6c   :  { %613 = vmatpush3.bf16.msra.mxu0 %v700_v28 }
  0x6d   :  { %614 = vmatprep.subr.bf16.mxu0 %v701_v29 }
  0x70   :  { %615 = vmatpush3.bf16.msra.mxu0 %v702_v30 }
  0x71   :  { %616 = vmatprep.subr.bf16.mxu0 %v703_v31 }
  0x74   :  { %617 = vmatpush3.bf16.msra.mxu0 %v704_v32 }
  0x75   :  { %618 = vmatprep.subr.bf16.mxu0 %v705_v33 }
  0x78   :  { %619 = vmatpush3.bf16.msra.mxu0 %v706_v34 }
  0x79   :  { %620 = vmatprep.subr.bf16.mxu0 %v707_v35 }
  0x7c   :  { %621 = vmatpush3.bf16.msra.mxu0 %v708_v36 }
  0x7d   :  { %622 = vmatprep.subr.bf16.mxu0 %v709_v37 }
  0x80   :  { %623 = vmatpush3.bf16.msra.mxu0 %v710_v48 }
  0x81   :  { %624 = vmatprep.subr.bf16.mxu0 %v711_v49 }
  0x84   :  { %625 = vmatpush3.bf16.msra.mxu0 %v712_v50 }
  0x85   :  { %626 = vmatprep.subr.bf16.mxu0 %v713_v51 }
  0x88   :  { %627 = vmatpush3.bf16.msra.mxu0 %v714_v52 }
 0x13e   :  { %v196_v39 = vpop.f32.mrb[0].mxu0 }
 0x13f   :  { %v197_v40 = vadd.f32 %v560_v38, %v196_v39  ;;  %v652_v41 = vpop.f32.mrb[1].mxu0 }
 0x140   :  { %v199_v42 = vpop.f32.mrb[2].mxu0 }
 0x141   :  { %v200_v43 = vadd.f32 %v560_v38, %v199_v42  ;;  %v653_v44 = vpop.f32.mrb[3].mxu0  ;;  %v203_v45 = vmax.f32 %v197_v40, 0.0 }
 0x143   :  { %v204_v46 = vmax.f32 %v200_v43, 0.0 }
 0x145   :  { %v205_v47 = vpack.c.bf16 %v204_v46, %v203_v45 }
 0x147   :  { %347 = vmatmul.mubr.bf16.vlgmr.msra.gmra.mrb[0].mxu1 %v205_v47 }
 0x21a   :  { %v348_v60 = vpop.f32.mrb[0].mxu1 }
 0x21b   :  { %v349_v61 = vadd.f32 %v348_v60, %v227_v58  ;;  %v350_v62 = vpop.f32.mrb[1].mxu1 }
 0x21c   :  { %v351_v63 = vadd.f32 %v350_v62, %v231_v59  ;;  %v352_v0 = vpop.f32.mrb[2].mxu1 }
 0x21d   :  { %v353_v1 = vadd.f32 %v352_v0, %v227_v58  ;;  %v354_v2 = vpop.f32.mrb[3].mxu1  ;;  %v357_v4 = vmax.f32 %v349_v61, 0.0 }
 0x21e   :  { %v355_v3 = vadd.f32 %v354_v2, %v231_v59  ;;  %v358_v6 = vmax.f32 %v351_v63, 0.0 }
 0x21f   :  { %v359_v5 = vmax.f32 %v353_v1, 0.0 }
 0x220   :  { %v360_v7 = vmax.f32 %v355_v3, 0.0 }
 0x221   :  { %v361_v8 = vpack.c.bf16 %v359_v5, %v357_v4 }
 0x222   :  { %v362_v9 = vpack.c.bf16 %v360_v7, %v358_v6 }
 0x224   :  { %530 = vmatprep.mubr.bf16.mxu0 %v362_v9 }
 0x225   :  { %531 = vmatmul.mubr.bf16.vlgmr.msra.gmra.mrb[4].mxu0 %v361_v8 }
 0x2f8   :  { %v628_v10 = vpop.f32.mrb[4].mxu0 }
 0x2f9   :  { %v629_v12 = vpop.f32.mrb[5].mxu0 }
 0x2fa   :  { %v630_v13 = vadd.f32 %v629_v12, %v628_v10  ;;  %v631_v14 = vpop.f32.mrb[6].mxu0 }
 0x2fb   :  { %v632_v15 = vpop.f32.mrb[7].mxu0 }
 0x2fc   :  { %v533_v16 = vadd.f32 %v630_v13, %v586_v11  ;;  %v633_v17 = vadd.f32 %v632_v15, %v631_v14 }
 0x2fe   :  { %539 = vst [vmem:[#allocation10] sm:$0xff] %v533_v16  ;;  %v536_v18 = vadd.f32 %v633_v17, %v586_v11 }
 0x300   :  { %540 = vst [vmem:[#allocation10 + $0x8] sm:$0xff] %v536_v18 }
 0x301   :  { %814 = shalt.err (!%p811_p8)
}
 0x302   :  { %s815_s11 = scalar_lea.hbm %s983_s7, 256 }
 0x303   :  { %p816_p9 = scmp.ne.s32.totalorder %s983_s7, %s815_s11  ;;  %p819_p10 = scmp.lt.u32.totalorder %s815_s11, %s983_s7 }
 0x305   :  { %p821_p11 = pnand %p819_p10, %p816_p9 }
 0x307   :  { %824 = shalt.err (!%p821_p11)
}
 0x308   :  { %552 = dma.vmem_to_hbm [thread:$0]  %s547_s8, 256, %s983_s7, [#allocation4], %s838_s0, %s838_s0, %s839_s27  }
 0x309   :  { %831 = dma.done.wait [#allocation4], 256  }
 0x30a   :  { %832 = vsyncadd [#allocation4], 4294967040 }
 0x30b   :  { %556 = vsyncpa [#allocation3], 1 }
 0x30c   :  { %557 = vsyncpa [#allocation6], 1 }
 0x30d   :  { %558 = vsyncpa [#allocation9], 1 }
 0x30e   :  { %559 = vsyncpa [#allocation4], 1 }

</bundles_post_ra>
